<compile_context>
chip_gen: v7x
topology: tpu7x:2x2x1
jax: 0.10.0
libtpu: 0.0.40
codegen_flags: <defaults>
</compile_context>

<pallas_src>
import jax
import jax.numpy as jnp
from jax.experimental import pallas as pl
from jax.experimental.pallas import tpu as pltpu


def _round_up(a, m):
    return ((a + m - 1) // m) * m


def _pad2d(a, rows, cols):
    r, c = a.shape
    return jnp.pad(a, ((0, rows - r), (0, cols - c)))


def _mlp_readout_kernel(x_ref, w1_ref, b1_ref, w2_ref, b2_ref, w3_ref, b3_ref, o_ref):
    # Cast the x tile to the compute dtype inside the kernel (VPU cast hidden
    # under the pipelined DMA; avoids a separate XLA pass over x in HBM).
    x = x_ref[...].astype(w1_ref.dtype)
    # Layer 0: bf16 dot on MXU, f32 accumulation; bias + ReLU in f32.
    y = jnp.dot(x, w1_ref[...], preferred_element_type=jnp.float32)
    y = jnp.maximum(y + b1_ref[...], 0.0)
    # Layer 1
    y = jnp.dot(y.astype(w2_ref.dtype), w2_ref[...], preferred_element_type=jnp.float32)
    y = jnp.maximum(y + b2_ref[...], 0.0)
    # Final layer (no activation)
    y = jnp.dot(y.astype(w3_ref.dtype), w3_ref[...], preferred_element_type=jnp.float32)
    y = y + b3_ref[...]
    o_ref[...] = y.astype(o_ref.dtype)


def mlp_readout(x, params, *, tile_n=1024, compute_dtype=jnp.bfloat16,
                out_dtype=None, return_padded=False,
                vmem_budget_bytes=None, vmem_limit_bytes=None):
    """x: (N, input_dim). params: dict of w1,b1,w2,b2,w3,b3 with (in, out) weights.

    out_dtype defaults to x.dtype; pass jnp.bfloat16 to halve the output
    writeback. return_padded=True returns the (N, round_up(out_dim,128)) array
    (padded columns are exact zeros) and skips the post-kernel column slice.
    """
    N, D = x.shape
    out_dtype = x.dtype if out_dtype is None else jnp.dtype(out_dtype)

    w1, b1 = params["w1"], params["b1"]
    w2, b2 = params["w2"], params["b2"]
    w3, b3 = params["w3"], params["b3"]
    h1, h2, out_dim = w1.shape[1], w2.shape[1], w3.shape[1]

    # Lane-dense zero-padding of hidden/output feature dims (exact math).
    # D (the dominant HBM x stream) is intentionally NOT padded.
    h1p, h2p, outp = (_round_up(d, 128) for d in (h1, h2, out_dim))

    w1p = _pad2d(w1, D, h1p).astype(compute_dtype)
    w2p = _pad2d(w2, h1p, h2p).astype(compute_dtype)
    w3p = _pad2d(w3, h2p, outp).astype(compute_dtype)
    # Biases stay f32: bias-add / ReLU are done in f32 inside the kernel.
    b1p = _pad2d(b1, 1, h1p).astype(jnp.float32)
    b2p = _pad2d(b2, 1, h2p).astype(jnp.float32)
    b3p = _pad2d(b3, 1, outp).astype(jnp.float32)

    # --- per-generation VMEM budget / limit ---
    try:
        info = pltpu.get_tpu_info()
        vmem_cap = int(getattr(info, "vmem_capacity_bytes", 64 << 20))
    except Exception:
        vmem_cap = 64 << 20  # conservative: assume the smallest (v7x) capacity
    if vmem_limit_bytes is None:
        vmem_limit_bytes = min(int(0.75 * vmem_cap), 96 << 20)
    if vmem_budget_bytes is None:
        vmem_budget_bytes = int(vmem_limit_bytes) // 2  # headroom for compiler scratch

    # --- size the row tile against the budget ---
    xb = jnp.dtype(x.dtype).itemsize
    cb = jnp.dtype(compute_dtype).itemsize
    ob = jnp.dtype(out_dtype).itemsize
    # double-buffered x/out tiles + f32 intermediates + bf16 copies for next dot
    per_row = (2 * D * xb + 2 * outp * ob
               + 4 * (h1p + h2p + outp) + cb * (h1p + h2p))
    # resident weights/biases, single-buffered (see pipeline_mode below)
    weight_bytes = sum(int(a.size) * a.dtype.itemsize
                       for a in (w1p, b1p, w2p, b2p, w3p, b3p))
    avail = int(vmem_budget_bytes) - weight_bytes
    if avail < per_row * 16:
        # TODO(synk): fall back to K-tiling the first layer when resident weights
        # alone exceed the VMEM budget (very large input_dim).
        raise ValueError(
            f"Resident weights ({weight_bytes} B) leave no room for a 16-row tile "
            f"within vmem_budget_bytes={vmem_budget_bytes}; raise vmem_budget_bytes/"
            f"vmem_limit_bytes or tile the first layer over K.")

    tile = min(int(tile_n), avail // per_row)
    if N >= 64:
        # Guarantee >= 2 grid steps so the "parallel" axis can shard across both
        # v7x TensorCores; costs nothing on single-TC v5e/v6e.
        tile = min(tile, _round_up(pl.cdiv(N, 2), 16))
    if tile >= 16:
        tile = (tile // 16) * 16          # bf16 packs 16 rows per sublane group
    else:
        tile = 8
    tile = min(tile, _round_up(N, 8))
    tile = max(8, (tile // 8) * 8)
    grid = (pl.cdiv(N, tile),)            # ragged last block is masked by Pallas

    def _run(single_buffer_weights):
        if single_buffer_weights:
            # Constant index_map -> fetched once; single VMEM buffer (no double
            # buffering needed for a block that never changes).
            const = lambda a: pl.BlockSpec(a.shape, lambda i: (0, 0),
                                           pipeline_mode=pl.Buffered(1))
        else:
            const = lambda a: pl.BlockSpec(a.shape, lambda i: (0, 0))
        return pl.pallas_call(
            _mlp_readout_kernel,
            out_shape=jax.ShapeDtypeStruct((N, outp), out_dtype),
            grid_spec=pltpu.PrefetchScalarGridSpec(
                num_scalar_prefetch=0,
                grid=grid,
                in_specs=[
                    pl.BlockSpec((tile, D), lambda i: (i, 0)),
                    const(w1p), const(b1p),
                    const(w2p), const(b2p),
                    const(w3p), const(b3p),
                ],
                out_specs=pl.BlockSpec((tile, outp), lambda i: (i, 0)),
            ),
            compiler_params=pltpu.CompilerParams(
                dimension_semantics=("parallel",),
                vmem_limit_bytes=int(vmem_limit_bytes)),
        )(x, w1p, b1p, w2p, b2p, w3p, b3p)

    try:
        out = _run(True)
    except Exception:
        # pipeline_mode=Buffered(1) unsupported on this jax version: fall back to
        # default double-buffered constant specs (same result, slightly more VMEM).
        out = _run(False)

    if return_padded:
        return out                        # padded columns >= out_dim are zeros
    return out[:, :out_dim]


def init_params(key, input_dim, output_dim, L=2, dtype=jnp.float32):
    """Deterministic synthetic init; shapes mirror nn.Linear(in, out) per layer."""
    dims = [input_dim // (2 ** l) for l in range(L + 1)] + [output_dim]
    params = {}
    for l in range(L + 1):
        key, kw, kb = jax.random.split(key, 3)
        fan_in, fan_out = dims[l], dims[l + 1]
        bound = 1.0 / (fan_in ** 0.5)  # same scale as PyTorch default Linear init
        params[f"w{l+1}"] = jax.random.uniform(
            kw, (fan_in, fan_out), dtype, minval=-bound, maxval=bound)
        params[f"b{l+1}"] = jax.random.uniform(
            kb, (1, fan_out), dtype, minval=-bound, maxval=bound)
    return params


def mlp_readout_ref_f32(x, params):
    """Pure f32 reference (PyTorch semantics)."""
    y = jnp.maximum(x @ params["w1"] + params["b1"], 0.0)
    y = jnp.maximum(y @ params["w2"] + params["b2"], 0.0)
    return y @ params["w3"] + params["b3"]


def mlp_readout_ref(x, params, compute_dtype=jnp.bfloat16):
    """Reference mirroring the kernel's dtype flow (bf16 operands, f32 accum/elementwise)."""
    cd = compute_dtype
    y = jnp.dot(x.astype(cd), params["w1"].astype(cd), preferred_element_type=jnp.float32)
    y = jnp.maximum(y + params["b1"].astype(jnp.float32), 0.0)
    y = jnp.dot(y.astype(cd), params["w2"].astype(cd), preferred_element_type=jnp.float32)
    y = jnp.maximum(y + params["b2"].astype(jnp.float32), 0.0)
    y = jnp.dot(y.astype(cd), params["w3"].astype(cd), preferred_element_type=jnp.float32)
    return (y + params["b3"].astype(jnp.float32)).astype(x.dtype)


if __name__ == "__main__":
    key = jax.random.PRNGKey(0)
    input_dim, output_dim, L = 32, 4, 2
    N = 8  # number of graph readout vectors (batch/nodes)

    key, kx = jax.random.split(key)
    x = jax.random.normal(kx, (N, input_dim), jnp.float32)
    params = init_params(key, input_dim, output_dim, L=L)

    out = jax.block_until_ready(mlp_readout(x, params))
    assert out.shape == (N, output_dim)

    # Tight check vs a reference with the same bf16/f32 dtype flow.
    ref_bf16 = mlp_readout_ref(x, params)
    assert jnp.allclose(out, ref_bf16, atol=1e-2, rtol=1e-2)

    # Loose sanity check vs the pure-f32 PyTorch-equivalent math.
    ref_f32 = mlp_readout_ref_f32(x, params)
    assert jnp.allclose(out, ref_f32, atol=5e-2, rtol=5e-2)

    # Ragged-N / multi-step grid path (partial last block handled by Pallas masking).
    key, kx2 = jax.random.split(key)
    x2 = jax.random.normal(kx2, (20, input_dim), jnp.float32)
    out2 = jax.block_until_ready(mlp_readout(x2, params, tile_n=8))
    assert out2.shape == (20, output_dim)
    ref2 = mlp_readout_ref(x2, params)
    assert jnp.allclose(out2, ref2, atol=1e-2, rtol=1e-2)

    print("KERNEL_OK")
</pallas_src>

<mosaic_0001>
module attributes {stable_mosaic.version = 11 : i64} {
  func.func @_mlp_readout_kernel(%arg0: i32, %arg1: memref<8x32xf32, #tpu.memory_space<vmem>>, %arg2: memref<32x128xbf16, #tpu.memory_space<vmem>>, %arg3: memref<1x128xf32, #tpu.memory_space<vmem>>, %arg4: memref<128x128xbf16, #tpu.memory_space<vmem>>, %arg5: memref<1x128xf32, #tpu.memory_space<vmem>>, %arg6: memref<128x128xbf16, #tpu.memory_space<vmem>>, %arg7: memref<1x128xf32, #tpu.memory_space<vmem>>, %arg8: memref<8x128xf32, #tpu.memory_space<vmem>>) attributes {dimension_semantics = [#tpu.dimension_semantics<parallel>], iteration_bounds = array<i64: 1>, scalar_prefetch = 0 : i64, scratch_operands = 0 : i64, tpu.core_type = #tpu.core_type<tc>, window_params = [{transform_indices = @transform_0, window_bounds = array<i64: 8, 32>}, {pipeline_mode = #tpu.pipeline_mode<synchronous>, transform_indices = @transform_1, window_bounds = array<i64: 32, 128>}, {pipeline_mode = #tpu.pipeline_mode<synchronous>, transform_indices = @transform_2, window_bounds = array<i64: 1, 128>}, {pipeline_mode = #tpu.pipeline_mode<synchronous>, transform_indices = @transform_3, window_bounds = array<i64: 128, 128>}, {pipeline_mode = #tpu.pipeline_mode<synchronous>, transform_indices = @transform_4, window_bounds = array<i64: 1, 128>}, {pipeline_mode = #tpu.pipeline_mode<synchronous>, transform_indices = @transform_5, window_bounds = array<i64: 128, 128>}, {pipeline_mode = #tpu.pipeline_mode<synchronous>, transform_indices = @transform_6, window_bounds = array<i64: 1, 128>}, {transform_indices = @transform_7, window_bounds = array<i64: 8, 128>}]} {
    %c0 = arith.constant 0 : index
    %c0_0 = arith.constant 0 : index
    %0 = vector.load %arg1[%c0, %c0_0] : memref<8x32xf32, #tpu.memory_space<vmem>>, vector<8x32xf32>
    %1 = arith.truncf %0 : vector<8x32xf32> to vector<8x32xbf16>
    %c0_1 = arith.constant 0 : index
    %c0_2 = arith.constant 0 : index
    %2 = vector.load %arg2[%c0_1, %c0_2] : memref<32x128xbf16, #tpu.memory_space<vmem>>, vector<32x128xbf16>
    %cst = arith.constant dense<0.000000e+00> : vector<8x128xf32>
    %3 = tpu.matmul %1, %2, %cst {dimension_numbers = #tpu.dot_dimension_numbers<[1], [0], [0], [1], [0, 0, 1, 1], [], []>} : vector<8x32xbf16>, vector<32x128xbf16>, vector<8x128xf32> -> vector<8x128xf32>
    %c0_3 = arith.constant 0 : index
    %c0_4 = arith.constant 0 : index
    %4 = vector.load %arg3[%c0_3, %c0_4] : memref<1x128xf32, #tpu.memory_space<vmem>>, vector<1x128xf32>
    %5 = vector.broadcast %4 : vector<1x128xf32> to vector<8x128xf32>
    %6 = arith.addf %3, %5 : vector<8x128xf32>
    %cst_5 = arith.constant 0.000000e+00 : f32
    %7 = vector.broadcast %cst_5 : f32 to vector<8x128xf32>
    %8 = arith.maximumf %6, %7 : vector<8x128xf32>
    %9 = arith.truncf %8 : vector<8x128xf32> to vector<8x128xbf16>
    %c0_6 = arith.constant 0 : index
    %c0_7 = arith.constant 0 : index
    %10 = vector.load %arg4[%c0_6, %c0_7] : memref<128x128xbf16, #tpu.memory_space<vmem>>, vector<128x128xbf16>
    %cst_8 = arith.constant dense<0.000000e+00> : vector<8x128xf32>
    %11 = tpu.matmul %9, %10, %cst_8 {dimension_numbers = #tpu.dot_dimension_numbers<[1], [0], [0], [1], [0, 0, 1, 1], [], []>} : vector<8x128xbf16>, vector<128x128xbf16>, vector<8x128xf32> -> vector<8x128xf32>
    %c0_9 = arith.constant 0 : index
    %c0_10 = arith.constant 0 : index
    %12 = vector.load %arg5[%c0_9, %c0_10] : memref<1x128xf32, #tpu.memory_space<vmem>>, vector<1x128xf32>
    %13 = vector.broadcast %12 : vector<1x128xf32> to vector<8x128xf32>
    %14 = arith.addf %11, %13 : vector<8x128xf32>
    %cst_11 = arith.constant 0.000000e+00 : f32
    %15 = vector.broadcast %cst_11 : f32 to vector<8x128xf32>
    %16 = arith.maximumf %14, %15 : vector<8x128xf32>
    %17 = arith.truncf %16 : vector<8x128xf32> to vector<8x128xbf16>
    %c0_12 = arith.constant 0 : index
    %c0_13 = arith.constant 0 : index
    %18 = vector.load %arg6[%c0_12, %c0_13] : memref<128x128xbf16, #tpu.memory_space<vmem>>, vector<128x128xbf16>
    %cst_14 = arith.constant dense<0.000000e+00> : vector<8x128xf32>
    %19 = tpu.matmul %17, %18, %cst_14 {dimension_numbers = #tpu.dot_dimension_numbers<[1], [0], [0], [1], [0, 0, 1, 1], [], []>} : vector<8x128xbf16>, vector<128x128xbf16>, vector<8x128xf32> -> vector<8x128xf32>
    %c0_15 = arith.constant 0 : index
    %c0_16 = arith.constant 0 : index
    %20 = vector.load %arg7[%c0_15, %c0_16] : memref<1x128xf32, #tpu.memory_space<vmem>>, vector<1x128xf32>
    %21 = vector.broadcast %20 : vector<1x128xf32> to vector<8x128xf32>
    %22 = arith.addf %19, %21 : vector<8x128xf32>
    %c0_17 = arith.constant 0 : index
    %c0_18 = arith.constant 0 : index
    %23 = vector.load %arg8[%c0_17, %c0_18] : memref<8x128xf32, #tpu.memory_space<vmem>>, vector<8x128xf32>
    tpu.vector_store %arg8[%c0_17, %c0_18], %22 {strides = array<i32>} : memref<8x128xf32, #tpu.memory_space<vmem>>, vector<8x128xf32>,
    return
  }
  func.func @transform_0(%arg0: i32) -> (i32, i32) {
    %c0_i32 = arith.constant 0 : i32
    %c0_i32_0 = arith.constant 0 : i32
    return %arg0, %c0_i32 : i32, i32
  }
  func.func @transform_1(%arg0: i32) -> (i32, i32) {
    %c0_i32 = arith.constant 0 : i32
    %c0_i32_0 = arith.constant 0 : i32
    %c0_i32_1 = arith.constant 0 : i32
    return %c0_i32, %c0_i32_0 : i32, i32
  }
  func.func @transform_2(%arg0: i32) -> (i32, i32) {
    %c0_i32 = arith.constant 0 : i32
    %c0_i32_0 = arith.constant 0 : i32
    %c0_i32_1 = arith.constant 0 : i32
    return %c0_i32, %c0_i32_0 : i32, i32
  }
  func.func @transform_3(%arg0: i32) -> (i32, i32) {
    %c0_i32 = arith.constant 0 : i32
    %c0_i32_0 = arith.constant 0 : i32
    %c0_i32_1 = arith.constant 0 : i32
    return %c0_i32, %c0_i32_0 : i32, i32
  }
  func.func @transform_4(%arg0: i32) -> (i32, i32) {
    %c0_i32 = arith.constant 0 : i32
    %c0_i32_0 = arith.constant 0 : i32
    %c0_i32_1 = arith.constant 0 : i32
    return %c0_i32, %c0_i32_0 : i32, i32
  }
  func.func @transform_5(%arg0: i32) -> (i32, i32) {
    %c0_i32 = arith.constant 0 : i32
    %c0_i32_0 = arith.constant 0 : i32
    %c0_i32_1 = arith.constant 0 : i32
    return %c0_i32, %c0_i32_0 : i32, i32
  }
  func.func @transform_6(%arg0: i32) -> (i32, i32) {
    %c0_i32 = arith.constant 0 : i32
    %c0_i32_0 = arith.constant 0 : i32
    %c0_i32_1 = arith.constant 0 : i32
    return %c0_i32, %c0_i32_0 : i32, i32
  }
  func.func @transform_7(%arg0: i32) -> (i32, i32) {
    %c0_i32 = arith.constant 0 : i32
    %c0_i32_0 = arith.constant 0 : i32
    return %arg0, %c0_i32 : i32, i32
  }
}

module attributes {stable_mosaic.version = 11 : i64} {
  func.func @_mlp_readout_kernel(%arg0: i32, %arg1: memref<8x32xf32, #tpu.memory_space<vmem>>, %arg2: memref<32x128xbf16, #tpu.memory_space<vmem>>, %arg3: memref<1x128xf32, #tpu.memory_space<vmem>>, %arg4: memref<128x128xbf16, #tpu.memory_space<vmem>>, %arg5: memref<1x128xf32, #tpu.memory_space<vmem>>, %arg6: memref<128x128xbf16, #tpu.memory_space<vmem>>, %arg7: memref<1x128xf32, #tpu.memory_space<vmem>>, %arg8: memref<8x128xf32, #tpu.memory_space<vmem>>) attributes {dimension_semantics = [#tpu.dimension_semantics<parallel>], iteration_bounds = array<i64: 1>, scalar_prefetch = 0 : i64, scratch_operands = 0 : i64, tpu.core_type = #tpu.core_type<tc>, window_params = [{transform_indices = @transform_0, window_bounds = array<i64: 8, 32>}, {pipeline_mode = #tpu.pipeline_mode<synchronous>, transform_indices = @transform_1, window_bounds = array<i64: 32, 128>}, {pipeline_mode = #tpu.pipeline_mode<synchronous>, transform_indices = @transform_2, window_bounds = array<i64: 1, 128>}, {pipeline_mode = #tpu.pipeline_mode<synchronous>, transform_indices = @transform_3, window_bounds = array<i64: 128, 128>}, {pipeline_mode = #tpu.pipeline_mode<synchronous>, transform_indices = @transform_4, window_bounds = array<i64: 1, 128>}, {pipeline_mode = #tpu.pipeline_mode<synchronous>, transform_indices = @transform_5, window_bounds = array<i64: 128, 128>}, {pipeline_mode = #tpu.pipeline_mode<synchronous>, transform_indices = @transform_6, window_bounds = array<i64: 1, 128>}, {transform_indices = @transform_7, window_bounds = array<i64: 8, 128>}]} {
    %c0 = arith.constant 0 : index
    %c0_0 = arith.constant 0 : index
    %0 = vector.load %arg1[%c0, %c0_0] : memref<8x32xf32, #tpu.memory_space<vmem>>, vector<8x32xf32>
    %1 = arith.truncf %0 : vector<8x32xf32> to vector<8x32xbf16>
    %c0_1 = arith.constant 0 : index
    %c0_2 = arith.constant 0 : index
    %2 = vector.load %arg2[%c0_1, %c0_2] : memref<32x128xbf16, #tpu.memory_space<vmem>>, vector<32x128xbf16>
    %cst = arith.constant dense<0.000000e+00> : vector<8x128xf32>
    %3 = tpu.matmul %1, %2, %cst {dimension_numbers = #tpu.dot_dimension_numbers<[1], [0], [0], [1], [0, 0, 1, 1], [], []>} : vector<8x32xbf16>, vector<32x128xbf16>, vector<8x128xf32> -> vector<8x128xf32>
    %c0_3 = arith.constant 0 : index
    %c0_4 = arith.constant 0 : index
    %4 = vector.load %arg3[%c0_3, %c0_4] : memref<1x128xf32, #tpu.memory_space<vmem>>, vector<1x128xf32>
    %5 = vector.broadcast %4 : vector<1x128xf32> to vector<8x128xf32>
    %6 = arith.addf %3, %5 : vector<8x128xf32>
    %cst_5 = arith.constant 0.000000e+00 : f32
    %7 = vector.broadcast %cst_5 : f32 to vector<8x128xf32>
    %8 = arith.maximumf %6, %7 : vector<8x128xf32>
    %9 = arith.truncf %8 : vector<8x128xf32> to vector<8x128xbf16>
    %c0_6 = arith.constant 0 : index
    %c0_7 = arith.constant 0 : index
    %10 = vector.load %arg4[%c0_6, %c0_7] : memref<128x128xbf16, #tpu.memory_space<vmem>>, vector<128x128xbf16>
    %cst_8 = arith.constant dense<0.000000e+00> : vector<8x128xf32>
    %11 = tpu.matmul %9, %10, %cst_8 {dimension_numbers = #tpu.dot_dimension_numbers<[1], [0], [0], [1], [0, 0, 1, 1], [], []>} : vector<8x128xbf16>, vector<128x128xbf16>, vector<8x128xf32> -> vector<8x128xf32>
    %c0_9 = arith.constant 0 : index
    %c0_10 = arith.constant 0 : index
    %12 = vector.load %arg5[%c0_9, %c0_10] : memref<1x128xf32, #tpu.memory_space<vmem>>, vector<1x128xf32>
    %13 = vector.broadcast %12 : vector<1x128xf32> to vector<8x128xf32>
    %14 = arith.addf %11, %13 : vector<8x128xf32>
    %cst_11 = arith.constant 0.000000e+00 : f32
    %15 = vector.broadcast %cst_11 : f32 to vector<8x128xf32>
    %16 = arith.maximumf %14, %15 : vector<8x128xf32>
    %17 = arith.truncf %16 : vector<8x128xf32> to vector<8x128xbf16>
    %c0_12 = arith.constant 0 : index
    %c0_13 = arith.constant 0 : index
    %18 = vector.load %arg6[%c0_12, %c0_13] : memref<128x128xbf16, #tpu.memory_space<vmem>>, vector<128x128xbf16>
    %cst_14 = arith.constant dense<0.000000e+00> : vector<8x128xf32>
    %19 = tpu.matmul %17, %18, %cst_14 {dimension_numbers = #tpu.dot_dimension_numbers<[1], [0], [0], [1], [0, 0, 1, 1], [], []>} : vector<8x128xbf16>, vector<128x128xbf16>, vector<8x128xf32> -> vector<8x128xf32>
    %c0_15 = arith.constant 0 : index
    %c0_16 = arith.constant 0 : index
    %20 = vector.load %arg7[%c0_15, %c0_16] : memref<1x128xf32, #tpu.memory_space<vmem>>, vector<1x128xf32>
    %21 = vector.broadcast %20 : vector<1x128xf32> to vector<8x128xf32>
    %22 = arith.addf %19, %21 : vector<8x128xf32>
    %c0_17 = arith.constant 0 : index
    %c0_18 = arith.constant 0 : index
    %23 = vector.load %arg8[%c0_17, %c0_18] : memref<8x128xf32, #tpu.memory_space<vmem>>, vector<8x128xf32>
    tpu.vector_store %arg8[%c0_17, %c0_18], %22 {strides = array<i32>} : memref<8x128xf32, #tpu.memory_space<vmem>>, vector<8x128xf32>,
    return
  }
  func.func @transform_0(%arg0: i32) -> (i32, i32) {
    %c0_i32 = arith.constant 0 : i32
    %c0_i32_0 = arith.constant 0 : i32
    return %arg0, %c0_i32 : i32, i32
  }
  func.func @transform_1(%arg0: i32) -> (i32, i32) {
    %c0_i32 = arith.constant 0 : i32
    %c0_i32_0 = arith.constant 0 : i32
    %c0_i32_1 = arith.constant 0 : i32
    return %c0_i32, %c0_i32_0 : i32, i32
  }
  func.func @transform_2(%arg0: i32) -> (i32, i32) {
    %c0_i32 = arith.constant 0 : i32
    %c0_i32_0 = arith.constant 0 : i32
    %c0_i32_1 = arith.constant 0 : i32
    return %c0_i32, %c0_i32_0 : i32, i32
  }
  func.func @transform_3(%arg0: i32) -> (i32, i32) {
    %c0_i32 = arith.constant 0 : i32
    %c0_i32_0 = arith.constant 0 : i32
    %c0_i32_1 = arith.constant 0 : i32
    return %c0_i32, %c0_i32_0 : i32, i32
  }
  func.func @transform_4(%arg0: i32) -> (i32, i32) {
    %c0_i32 = arith.constant 0 : i32
    %c0_i32_0 = arith.constant 0 : i32
    %c0_i32_1 = arith.constant 0 : i32
    return %c0_i32, %c0_i32_0 : i32, i32
  }
  func.func @transform_5(%arg0: i32) -> (i32, i32) {
    %c0_i32 = arith.constant 0 : i32
    %c0_i32_0 = arith.constant 0 : i32
    %c0_i32_1 = arith.constant 0 : i32
    return %c0_i32, %c0_i32_0 : i32, i32
  }
  func.func @transform_6(%arg0: i32) -> (i32, i32) {
    %c0_i32 = arith.constant 0 : i32
    %c0_i32_0 = arith.constant 0 : i32
    %c0_i32_1 = arith.constant 0 : i32
    return %c0_i32, %c0_i32_0 : i32, i32
  }
  func.func @transform_7(%arg0: i32) -> (i32, i32) {
    %c0_i32 = arith.constant 0 : i32
    %c0_i32_0 = arith.constant 0 : i32
    return %arg0, %c0_i32 : i32, i32
  }
}

</mosaic_0001>

<bundles_post_ra>
// kernel: tpu_custom_call.1
= control target key start
LH: loop header
LB: loop body
LE: loop exit
PB: predicated region body
PF: predicated region fallthrough
CT: control target
= control target key end

     0   :  { %12 = vsyncpa [#allocation3], 0  ;;  %s781_s0 = inlined_call_operand.hbm [shape: f32[8,32], index: 0, kind: input, shape index: {}]   ;;  %s782_s1 = inlined_call_operand.hbm [shape: bf16[32,128], index: 1, kind: input, shape index: {}]   ;;  %s783_s2 = inlined_call_operand.vmem [shape: f32[1,128], index: 2, kind: input, shape index: {}]   ;;  %s784_s3 = inlined_call_operand.hbm [shape: bf16[128,128], index: 3, kind: input, shape index: {}]   ;;  %s785_s4 = inlined_call_operand.vmem [shape: f32[1,128], index: 4, kind: input, shape index: {}]   ;;  %s786_s5 = inlined_call_operand.hbm [shape: bf16[128,128], index: 5, kind: input, shape index: {}]   ;;  %s787_s6 = inlined_call_operand.vmem [shape: f32[1,128], index: 6, kind: input, shape index: {}]   ;;  %s788_s7 = inlined_call_operand.hbm [shape: f32[8,128], index: 7, kind: output, shape index: {}]  }
   0x1   :  { %13 = vsyncpa [#allocation6], 0 }
   0x2   :  { %14 = vsyncpa [#allocation9], 0 }
   0x3   :  { %15 = vsyncpa [#allocation4], 0  ;;  %s630_s24 = smov [#allocation5]   ;;  %s512_s28 = scalar_lea.hbm %s782_s1, 256 }
   0x4   :  { %s31_s25 = sshll.u32 %s630_s24, 4  ;;  %p513_p0 = scmp.ne.s32.totalorder %s782_s1, %s512_s28  ;;  %s32_s25 = int_to_ptr.vmem [resolvable:$true] %s31_s25 }
   0x5   :  { %p516_p1 = scmp.lt.u32.totalorder %s512_s28, %s782_s1 }
   0x7   :  { %p518_p2 = pnand %p516_p1, %p513_p0 }
   0x9   :  { %521 = shalt.err (!%p518_p2)
}
   0xa   :  { %s522_s10 = scalar_lea.vmem %s32_s25, 256  ;;  %p527_p4 = scmp.lt.s32.totalorder %s32_s25, %s32_s25 }
   0xb   :  { %p523_p3 = scmp.ne.s32.totalorder %s32_s25, %s522_s10  ;;  %p528_p5 = scmp.lt.s32.totalorder %s522_s10, %s522_s10 }
   0xd   :  { %p529_p6 = por %p528_p5, %p527_p4 }
   0xf   :  { %p530_p7 = pnand %p529_p6, %p523_p3 }
  0x11   :  { %533 = shalt.err (!%p530_p7)
}
  0x12   :  { %s631_s11 = smov 64   ;;  %s632_s12 = smov 4  }
  0x13   :  { %37 = dma.hbm_to_vmem [thread:$0]  %s782_s1, 256, %s32_s25, [#allocation6], %s631_s11, %s631_s11, %s632_s12  }
  0x14   :  { %s633_s15 = smov [#allocation2]   ;;  %s634_s17 = smov [#allocation7]  }
  0x15   :  { %s22_s16 = sshll.u32 %s633_s15, 4  ;;  %s45_s18 = sshll.u32 %s634_s17, 4  ;;  %s23_s16 = int_to_ptr.vmem [resolvable:$true] %s22_s16  ;;  %s46_s18 = int_to_ptr.vmem [resolvable:$true] %s45_s18 }
  0x16   :  { %s534_s21 = scalar_lea.hbm %s781_s0, 128 }
  0x17   :  { %p535_p8 = scmp.ne.s32.totalorder %s781_s0, %s534_s21  ;;  %p538_p9 = scmp.lt.u32.totalorder %s534_s21, %s781_s0 }
  0x19   :  { %p540_p10 = pnand %p538_p9, %p535_p8 }
  0x1b   :  { %543 = shalt.err (!%p540_p10)
}
  0x1c   :  { %s544_s1 = scalar_lea.vmem %s23_s16, 128  ;;  %p549_p12 = scmp.lt.s32.totalorder %s23_s16, %s23_s16 }
  0x1d   :  { %p545_p11 = scmp.ne.s32.totalorder %s23_s16, %s544_s1  ;;  %p550_p13 = scmp.lt.s32.totalorder %s544_s1, %s544_s1 }
  0x1f   :  { %p551_p0 = por %p550_p13, %p549_p12 }
  0x21   :  { %p552_p1 = pnand %p551_p0, %p545_p11 }
  0x23   :  { %555 = shalt.err (!%p552_p1)
}
  0x24   :  { %25 = dma.hbm_to_vmem [thread:$0]  %s781_s0, 128, %s23_s16, [#allocation3]  }
  0x25   :  { %s556_s30 = scalar_lea.hbm %s784_s3, 1024 }
  0x26   :  { %p557_p2 = scmp.ne.s32.totalorder %s784_s3, %s556_s30  ;;  %p560_p3 = scmp.lt.u32.totalorder %s556_s30, %s784_s3 }
  0x28   :  { %p562_p4 = pnand %p560_p3, %p557_p2 }
  0x2a   :  { %565 = shalt.err (!%p562_p4)
}
  0x2b   :  { %s566_s14 = scalar_lea.vmem %s46_s18, 1024  ;;  %p571_p6 = scmp.lt.s32.totalorder %s46_s18, %s46_s18 }
  0x2c   :  { %p567_p5 = scmp.ne.s32.totalorder %s46_s18, %s566_s14  ;;  %p572_p7 = scmp.lt.s32.totalorder %s566_s14, %s566_s14 }
  0x2e   :  { %p573_p8 = por %p572_p7, %p571_p6 }
  0x30   :  { %p574_p9 = pnand %p573_p8, %p567_p5 }
  0x32   :  { %577 = shalt.err (!%p574_p9)
}
  0x33   :  { %51 = dma.hbm_to_vmem [thread:$0]  %s784_s3, 1024, %s46_s18, [#allocation6], %s631_s11, %s631_s11, %s632_s12  }
  0x34   :  { %s635_s16 = smov [#allocation8]   ;;  %s578_s21 = scalar_lea.hbm %s786_s5, 1024 }
  0x35   :  { %s59_s17 = sshll.u32 %s635_s16, 4  ;;  %p579_p10 = scmp.ne.s32.totalorder %s786_s5, %s578_s21  ;;  %s60_s17 = int_to_ptr.vmem [resolvable:$true] %s59_s17 }
  0x36   :  { %p582_p11 = scmp.lt.u32.totalorder %s578_s21, %s786_s5 }
  0x38   :  { %p584_p12 = pnand %p582_p11, %p579_p10 }
  0x3a   :  { %587 = shalt.err (!%p584_p12)
}
  0x3b   :  { %s588_s1 = scalar_lea.vmem %s60_s17, 1024  ;;  %p593_p0 = scmp.lt.s32.totalorder %s60_s17, %s60_s17 }
  0x3c   :  { %p589_p13 = scmp.ne.s32.totalorder %s60_s17, %s588_s1  ;;  %p594_p1 = scmp.lt.s32.totalorder %s588_s1, %s588_s1 }
  0x3e   :  { %p595_p2 = por %p594_p1, %p593_p0 }
  0x40   :  { %p596_p3 = pnand %p595_p2, %p589_p13 }
  0x42   :  { %599 = shalt.err (!%p596_p3)
}
  0x43   :  { %65 = dma.hbm_to_vmem [thread:$0]  %s786_s5, 1024, %s60_s17, [#allocation9], %s631_s11, %s631_s11, %s632_s12  }
  0x44   :  { %622 = dma.done.wait [#allocation3], 128  }
  0x45   :  { %623 = vsyncadd [#allocation3], 4294967168 }
  0x46   :  { %624 = dma.done.wait [#allocation6], 1280  }
  0x47   :  { %625 = vsyncadd [#allocation6], 4294966016 }
  0x48   :  { %626 = dma.done.wait [#allocation9], 1024  }
  0x49   :  { %627 = vsyncadd [#allocation9], 4294966272  ;;  %v636_v0 = vmov 0.0   ;;  %vm637_vm0 = vmmov 0   ;;  %v494_v1 = vld [vmem:[#allocation5] sm:$0xff]   ;;  %v495_v2 = vld [vmem:[#allocation5 + $0x8] sm:$0xff]  }
  0x4a   :  { %437 = vmatprep.subr.bf16.mxu0 %v636_v0  ;;  %441 = vmatprep.mubr.msk.bf16.mxu0 %vm637_vm0, %v636_v0  ;;  %v81_v3 = vld [vmem:[#allocation2] sm:$0xff]  ;;  %v496_v4 = vld [vmem:[#allocation7] sm:$0xff]   ;;  %vm106_vm1 = vcmask 261120   ;;  %v498_v7 = vld [vmem:[#allocation7 + $0x10] sm:$0xff]   ;;  %s638_s28 = smov [#allocation10]  }
  0x4b   :  { %445 = vmatprep.subr.bf16.mxu1 %v636_v0  ;;  %461 = vmatprep.mubr.msk.bf16.mxu1 %vm637_vm0, %v636_v0  ;;  %v82_v5 = vpack.c.bf16 %v81_v3, %v81_v3  ;;  %v497_v6 = vld [vmem:[#allocation7 + $0x8] sm:$0xff]   ;;  %v499_v8 = vld [vmem:[#allocation7 + $0x18] sm:$0xff]   ;;  %v500_v9 = vld [vmem:[#allocation7 + $0x20] sm:$0xff]   ;;  %s383_s29 = sshll.u32 %s638_s28, 4  ;;  %s384_s29 = int_to_ptr.vmem [resolvable:$true] %s383_s29 }
  0x4c   :  { %438 = vmatpush3.bf16.msra.mxu0 %v494_v1  ;;  %446 = vmatpush3.bf16.msra.mxu1 %v496_v4  ;;  %v501_v10 = vld [vmem:[#allocation7 + $0x28] sm:$0xff]   ;;  %v502_v11 = vld [vmem:[#allocation7 + $0x30] sm:$0xff]   ;;  %v503_v12 = vld [vmem:[#allocation7 + $0x38] sm:$0xff]   ;;  %p605_p5 = scmp.lt.s32.totalorder %s384_s29, %s384_s29 }
  0x4d   :  { %439 = vmatprep.subr.bf16.mxu0 %v636_v0  ;;  %447 = vmatprep.subr.bf16.mxu1 %v636_v0  ;;  %v504_v13 = vld [vmem:[#allocation8] sm:$0xff]   ;;  %v505_v14 = vld [vmem:[#allocation8 + $0x8] sm:$0xff]   ;;  %v506_v15 = vld [vmem:[#allocation8 + $0x10] sm:$0xff]  }
  0x4e   :  { %v507_v16 = vld [vmem:[#allocation8 + $0x18] sm:$0xff]   ;;  %v508_v17 = vld [vmem:[#allocation8 + $0x20] sm:$0xff]   ;;  %v509_v18 = vld [vmem:[#allocation8 + $0x28] sm:$0xff]  }
  0x4f   :  { %v394_v19 = vld [vmem:[%s783_s2] ss:$0 sm:$0xff]  ;;  %v510_v27 = vld [vmem:[#allocation8 + $0x30] sm:$0xff]   ;;  %v511_v28 = vld [vmem:[#allocation8 + $0x38] sm:$0xff]  }
  0x50   :  { %440 = vmatpush3.bf16.msra.mxu0 %v495_v2  ;;  %448 = vmatpush3.bf16.msra.mxu1 %v497_v6  ;;  %v398_v29 = vld [vmem:[%s785_s4] ss:$0 sm:$0xff]  ;;  %s600_s4 = scalar_lea.vmem %s384_s29, 128 }
  0x51   :  { %465 = vmatprep.subr.bf16.mxu0 %v636_v0  ;;  %449 = vmatprep.subr.bf16.mxu1 %v636_v0  ;;  %v407_v37 = vld [vmem:[%s787_s6] ss:$0 sm:$0xff]  ;;  %p601_p4 = scmp.ne.s32.totalorder %s384_s29, %s600_s4  ;;  %p606_p6 = scmp.lt.s32.totalorder %s600_s4, %s600_s4 }
  0x53   :  { %442 = vmatmul.mubr.msk.bf16.vlgmr.msra.gmra.mrb[0].mxu0 %vm106_vm1, %v82_v5  ;;  %p607_p7 = por %p606_p6, %p605_p5 }
  0x54   :  { %481 = vmatprep.mubr.msk.bf16.mxu0 %vm637_vm0, %v636_v0  ;;  %450 = vmatpush3.bf16.msra.mxu1 %v498_v7 }
  0x55   :  { %451 = vmatprep.subr.bf16.mxu1 %v636_v0  ;;  %466 = vmatpush3.bf16.msra.mxu0 %v504_v13  ;;  %p608_p8 = pnand %p607_p7, %p601_p4 }
  0x56   :  { %467 = vmatprep.subr.bf16.mxu0 %v636_v0 }
  0x58   :  { %452 = vmatpush3.bf16.msra.mxu1 %v499_v8 }
  0x59   :  { %453 = vmatprep.subr.bf16.mxu1 %v636_v0  ;;  %468 = vmatpush3.bf16.msra.mxu0 %v505_v14 }
  0x5a   :  { %469 = vmatprep.subr.bf16.mxu0 %v636_v0 }
  0x5c   :  { %454 = vmatpush3.bf16.msra.mxu1 %v500_v9 }
  0x5d   :  { %455 = vmatprep.subr.bf16.mxu1 %v636_v0  ;;  %470 = vmatpush3.bf16.msra.mxu0 %v506_v15 }
  0x5e   :  { %471 = vmatprep.subr.bf16.mxu0 %v636_v0 }
  0x60   :  { %456 = vmatpush3.bf16.msra.mxu1 %v501_v10 }
  0x61   :  { %457 = vmatprep.subr.bf16.mxu1 %v636_v0  ;;  %472 = vmatpush3.bf16.msra.mxu0 %v507_v16 }
  0x62   :  { %473 = vmatprep.subr.bf16.mxu0 %v636_v0 }
  0x64   :  { %458 = vmatpush3.bf16.msra.mxu1 %v502_v11 }
  0x65   :  { %459 = vmatprep.subr.bf16.mxu1 %v636_v0  ;;  %474 = vmatpush3.bf16.msra.mxu0 %v508_v17 }
  0x66   :  { %475 = vmatprep.subr.bf16.mxu0 %v636_v0 }
  0x68   :  { %460 = vmatpush3.bf16.msra.mxu1 %v503_v12 }
  0x69   :  { %476 = vmatpush3.bf16.msra.mxu0 %v509_v18 }
  0x6a   :  { %477 = vmatprep.subr.bf16.mxu0 %v636_v0 }
  0x6d   :  { %478 = vmatpush3.bf16.msra.mxu0 %v510_v27 }
  0x6e   :  { %479 = vmatprep.subr.bf16.mxu0 %v636_v0 }
  0x71   :  { %480 = vmatpush3.bf16.msra.mxu0 %v511_v28 }
 0x126   :  { %v144_v20 = vpop.f32.mrb[0].mxu0 }
 0x127   :  { %v145_v21 = vadd.f32 %v394_v19, %v144_v20  ;;  %v443_v22 = vpop.f32.mrb[1].mxu0 }
 0x128   :  { %v147_v23 = vpop.f32.mrb[2].mxu0 }
 0x129   :  { %v150_v24 = vmax.f32 %v145_v21, 0.0  ;;  %v444_v25 = vpop.f32.mrb[3].mxu0 }
 0x12b   :  { %v151_v26 = vpack.c.bf16 %v150_v24, %v150_v24 }
 0x12d   :  { %462 = vmatmul.mubr.bf16.vlgmr.msra.gmra.mrb[0].mxu1 %v151_v26 }
 0x200   :  { %v257_v30 = vpop.f32.mrb[0].mxu1 }
 0x201   :  { %v258_v31 = vadd.f32 %v398_v29, %v257_v30  ;;  %v463_v32 = vpop.f32.mrb[1].mxu1 }
 0x202   :  { %v260_v33 = vpop.f32.mrb[2].mxu1 }
 0x203   :  { %v263_v34 = vmax.f32 %v258_v31, 0.0  ;;  %v464_v35 = vpop.f32.mrb[3].mxu1 }
 0x205   :  { %v264_v36 = vpack.c.bf16 %v263_v34, %v263_v34 }
 0x207   :  { %482 = vmatmul.mubr.bf16.vlgmr.msra.gmra.mrb[4].mxu0 %v264_v36 }
 0x2da   :  { %v370_v38 = vpop.f32.mrb[4].mxu0 }
 0x2db   :  { %v371_v39 = vadd.f32 %v407_v37, %v370_v38  ;;  %v483_v40 = vpop.f32.mrb[5].mxu0 }
 0x2dc   :  { %v373_v41 = vpop.f32.mrb[6].mxu0 }
 0x2dd   :  { %376 = vst [vmem:[#allocation10] sm:$0xff] %v371_v39  ;;  %v484_v42 = vpop.f32.mrb[7].mxu0 }
 0x2de   :  { %611 = shalt.err (!%p608_p8)
}
 0x2df   :  { %s612_s6 = scalar_lea.hbm %s788_s7, 128 }
 0x2e0   :  { %p613_p9 = scmp.ne.s32.totalorder %s788_s7, %s612_s6  ;;  %p616_p10 = scmp.lt.u32.totalorder %s612_s6, %s788_s7 }
 0x2e2   :  { %p618_p11 = pnand %p616_p10, %p613_p9 }
 0x2e4   :  { %621 = shalt.err (!%p618_p11)
}
 0x2e5   :  { %386 = dma.vmem_to_hbm [thread:$0]  %s384_s29, 128, %s788_s7, [#allocation4]  }
 0x2e6   :  { %628 = dma.done.wait [#allocation4], 128  }
 0x2e7   :  { %629 = vsyncadd [#allocation4], 4294967168 }
 0x2e8   :  { %390 = vsyncpa [#allocation3], 1 }
 0x2e9   :  { %391 = vsyncpa [#allocation6], 1 }
 0x2ea   :  { %392 = vsyncpa [#allocation9], 1 }
 0x2eb   :  { %393 = vsyncpa [#allocation4], 1 }

// kernel: tpu_custom_call.1
= control target key start
LH: loop header
LB: loop body
LE: loop exit
PB: predicated region body
PF: predicated region fallthrough
CT: control target
= control target key end

     0   :  { %12 = vsyncpa [#allocation3], 0  ;;  %s781_s0 = inlined_call_operand.hbm [shape: f32[8,32], index: 0, kind: input, shape index: {}]   ;;  %s782_s1 = inlined_call_operand.hbm [shape: bf16[32,128], index: 1, kind: input, shape index: {}]   ;;  %s783_s2 = inlined_call_operand.vmem [shape: f32[1,128], index: 2, kind: input, shape index: {}]   ;;  %s784_s3 = inlined_call_operand.hbm [shape: bf16[128,128], index: 3, kind: input, shape index: {}]   ;;  %s785_s4 = inlined_call_operand.vmem [shape: f32[1,128], index: 4, kind: input, shape index: {}]   ;;  %s786_s5 = inlined_call_operand.hbm [shape: bf16[128,128], index: 5, kind: input, shape index: {}]   ;;  %s787_s6 = inlined_call_operand.vmem [shape: f32[1,128], index: 6, kind: input, shape index: {}]   ;;  %s788_s7 = inlined_call_operand.hbm [shape: f32[8,128], index: 7, kind: output, shape index: {}]  }
   0x1   :  { %13 = vsyncpa [#allocation6], 0 }
   0x2   :  { %14 = vsyncpa [#allocation9], 0 }
   0x3   :  { %15 = vsyncpa [#allocation4], 0  ;;  %s630_s24 = smov [#allocation5]   ;;  %s512_s28 = scalar_lea.hbm %s782_s1, 256 }
   0x4   :  { %s31_s25 = sshll.u32 %s630_s24, 4  ;;  %p513_p0 = scmp.ne.s32.totalorder %s782_s1, %s512_s28  ;;  %s32_s25 = int_to_ptr.vmem [resolvable:$true] %s31_s25 }
   0x5   :  { %p516_p1 = scmp.lt.u32.totalorder %s512_s28, %s782_s1 }
   0x7   :  { %p518_p2 = pnand %p516_p1, %p513_p0 }
   0x9   :  { %521 = shalt.err (!%p518_p2)
}
   0xa   :  { %s522_s10 = scalar_lea.vmem %s32_s25, 256  ;;  %p527_p4 = scmp.lt.s32.totalorder %s32_s25, %s32_s25 }
   0xb   :  { %p523_p3 = scmp.ne.s32.totalorder %s32_s25, %s522_s10  ;;  %p528_p5 = scmp.lt.s32.totalorder %s522_s10, %s522_s10 }
   0xd   :  { %p529_p6 = por %p528_p5, %p527_p4 }
   0xf   :  { %p530_p7 = pnand %p529_p6, %p523_p3 }
  0x11   :  { %533 = shalt.err (!%p530_p7)
}
  0x12   :  { %s631_s11 = smov 64   ;;  %s632_s12 = smov 4  }
  0x13   :  { %37 = dma.hbm_to_vmem [thread:$0]  %s782_s1, 256, %s32_s25, [#allocation6], %s631_s11, %s631_s11, %s632_s12  }
  0x14   :  { %s633_s15 = smov [#allocation2]   ;;  %s634_s17 = smov [#allocation7]  }
  0x15   :  { %s22_s16 = sshll.u32 %s633_s15, 4  ;;  %s45_s18 = sshll.u32 %s634_s17, 4  ;;  %s23_s16 = int_to_ptr.vmem [resolvable:$true] %s22_s16  ;;  %s46_s18 = int_to_ptr.vmem [resolvable:$true] %s45_s18 }
  0x16   :  { %s534_s21 = scalar_lea.hbm %s781_s0, 128 }
  0x17   :  { %p535_p8 = scmp.ne.s32.totalorder %s781_s0, %s534_s21  ;;  %p538_p9 = scmp.lt.u32.totalorder %s534_s21, %s781_s0 }
  0x19   :  { %p540_p10 = pnand %p538_p9, %p535_p8 }
  0x1b   :  { %543 = shalt.err (!%p540_p10)
}
  0x1c   :  { %s544_s1 = scalar_lea.vmem %s23_s16, 128  ;;  %p549_p12 = scmp.lt.s32.totalorder %s23_s16, %s23_s16 }
  0x1d   :  { %p545_p11 = scmp.ne.s32.totalorder %s23_s16, %s544_s1  ;;  %p550_p13 = scmp.lt.s32.totalorder %s544_s1, %s544_s1 }
  0x1f   :  { %p551_p0 = por %p550_p13, %p549_p12 }
  0x21   :  { %p552_p1 = pnand %p551_p0, %p545_p11 }
  0x23   :  { %555 = shalt.err (!%p552_p1)
}
  0x24   :  { %25 = dma.hbm_to_vmem [thread:$0]  %s781_s0, 128, %s23_s16, [#allocation3]  }
  0x25   :  { %s556_s30 = scalar_lea.hbm %s784_s3, 1024 }
  0x26   :  { %p557_p2 = scmp.ne.s32.totalorder %s784_s3, %s556_s30  ;;  %p560_p3 = scmp.lt.u32.totalorder %s556_s30, %s784_s3 }
  0x28   :  { %p562_p4 = pnand %p560_p3, %p557_p2 }
  0x2a   :  { %565 = shalt.err (!%p562_p4)
}
  0x2b   :  { %s566_s14 = scalar_lea.vmem %s46_s18, 1024  ;;  %p571_p6 = scmp.lt.s32.totalorder %s46_s18, %s46_s18 }
  0x2c   :  { %p567_p5 = scmp.ne.s32.totalorder %s46_s18, %s566_s14  ;;  %p572_p7 = scmp.lt.s32.totalorder %s566_s14, %s566_s14 }
  0x2e   :  { %p573_p8 = por %p572_p7, %p571_p6 }
  0x30   :  { %p574_p9 = pnand %p573_p8, %p567_p5 }
  0x32   :  { %577 = shalt.err (!%p574_p9)
}
  0x33   :  { %51 = dma.hbm_to_vmem [thread:$0]  %s784_s3, 1024, %s46_s18, [#allocation6], %s631_s11, %s631_s11, %s632_s12  }
  0x34   :  { %s635_s16 = smov [#allocation8]   ;;  %s578_s21 = scalar_lea.hbm %s786_s5, 1024 }
  0x35   :  { %s59_s17 = sshll.u32 %s635_s16, 4  ;;  %p579_p10 = scmp.ne.s32.totalorder %s786_s5, %s578_s21  ;;  %s60_s17 = int_to_ptr.vmem [resolvable:$true] %s59_s17 }
  0x36   :  { %p582_p11 = scmp.lt.u32.totalorder %s578_s21, %s786_s5 }
  0x38   :  { %p584_p12 = pnand %p582_p11, %p579_p10 }
  0x3a   :  { %587 = shalt.err (!%p584_p12)
}
  0x3b   :  { %s588_s1 = scalar_lea.vmem %s60_s17, 1024  ;;  %p593_p0 = scmp.lt.s32.totalorder %s60_s17, %s60_s17 }
  0x3c   :  { %p589_p13 = scmp.ne.s32.totalorder %s60_s17, %s588_s1  ;;  %p594_p1 = scmp.lt.s32.totalorder %s588_s1, %s588_s1 }
  0x3e   :  { %p595_p2 = por %p594_p1, %p593_p0 }
  0x40   :  { %p596_p3 = pnand %p595_p2, %p589_p13 }
  0x42   :  { %599 = shalt.err (!%p596_p3)
}
  0x43   :  { %65 = dma.hbm_to_vmem [thread:$0]  %s786_s5, 1024, %s60_s17, [#allocation9], %s631_s11, %s631_s11, %s632_s12  }
  0x44   :  { %622 = dma.done.wait [#allocation3], 128  }
  0x45   :  { %623 = vsyncadd [#allocation3], 4294967168 }
  0x46   :  { %624 = dma.done.wait [#allocation6], 1280  }
  0x47   :  { %625 = vsyncadd [#allocation6], 4294966016 }
  0x48   :  { %626 = dma.done.wait [#allocation9], 1024  }
  0x49   :  { %627 = vsyncadd [#allocation9], 4294966272  ;;  %v636_v0 = vmov 0.0   ;;  %vm637_vm0 = vmmov 0   ;;  %v494_v1 = vld [vmem:[#allocation5] sm:$0xff]   ;;  %v495_v2 = vld [vmem:[#allocation5 + $0x8] sm:$0xff]  }
  0x4a   :  { %437 = vmatprep.subr.bf16.mxu0 %v636_v0  ;;  %441 = vmatprep.mubr.msk.bf16.mxu0 %vm637_vm0, %v636_v0  ;;  %v81_v3 = vld [vmem:[#allocation2] sm:$0xff]  ;;  %v496_v4 = vld [vmem:[#allocation7] sm:$0xff]   ;;  %vm106_vm1 = vcmask 261120   ;;  %v498_v7 = vld [vmem:[#allocation7 + $0x10] sm:$0xff]   ;;  %s638_s28 = smov [#allocation10]  }
  0x4b   :  { %445 = vmatprep.subr.bf16.mxu1 %v636_v0  ;;  %461 = vmatprep.mubr.msk.bf16.mxu1 %vm637_vm0, %v636_v0  ;;  %v82_v5 = vpack.c.bf16 %v81_v3, %v81_v3  ;;  %v497_v6 = vld [vmem:[#allocation7 + $0x8] sm:$0xff]   ;;  %v499_v8 = vld [vmem:[#allocation7 + $0x18] sm:$0xff]   ;;  %v500_v9 = vld [vmem:[#allocation7 + $0x20] sm:$0xff]   ;;  %s383_s29 = sshll.u32 %s638_s28, 4  ;;  %s384_s29 = int_to_ptr.vmem [resolvable:$true] %s383_s29 }
  0x4c   :  { %438 = vmatpush3.bf16.msra.mxu0 %v494_v1  ;;  %446 = vmatpush3.bf16.msra.mxu1 %v496_v4  ;;  %v501_v10 = vld [vmem:[#allocation7 + $0x28] sm:$0xff]   ;;  %v502_v11 = vld [vmem:[#allocation7 + $0x30] sm:$0xff]   ;;  %v503_v12 = vld [vmem:[#allocation7 + $0x38] sm:$0xff]   ;;  %p605_p5 = scmp.lt.s32.totalorder %s384_s29, %s384_s29 }
  0x4d   :  { %439 = vmatprep.subr.bf16.mxu0 %v636_v0  ;;  %447 = vmatprep.subr.bf16.mxu1 %v636_v0  ;;  %v504_v13 = vld [vmem:[#allocation8] sm:$0xff]   ;;  %v505_v14 = vld [vmem:[#allocation8 + $0x8] sm:$0xff]   ;;  %v506_v15 = vld [vmem:[#allocation8 + $0x10] sm:$0xff]  }
  0x4e   :  { %v507_v16 = vld [vmem:[#allocation8 + $0x18] sm:$0xff]   ;;  %v508_v17 = vld [vmem:[#allocation8 + $0x20] sm:$0xff]   ;;  %v509_v18 = vld [vmem:[#allocation8 + $0x28] sm:$0xff]  }
  0x4f   :  { %v394_v19 = vld [vmem:[%s783_s2] ss:$0 sm:$0xff]  ;;  %v510_v27 = vld [vmem:[#allocation8 + $0x30] sm:$0xff]   ;;  %v511_v28 = vld [vmem:[#allocation8 + $0x38] sm:$0xff]  }
  0x50   :  { %440 = vmatpush3.bf16.msra.mxu0 %v495_v2  ;;  %448 = vmatpush3.bf16.msra.mxu1 %v497_v6  ;;  %v398_v29 = vld [vmem:[%s785_s4] ss:$0 sm:$0xff]  ;;  %s600_s4 = scalar_lea.vmem %s384_s29, 128 }
  0x51   :  { %465 = vmatprep.subr.bf16.mxu0 %v636_v0  ;;  %449 = vmatprep.subr.bf16.mxu1 %v636_v0  ;;  %v407_v37 = vld [vmem:[%s787_s6] ss:$0 sm:$0xff]  ;;  %p601_p4 = scmp.ne.s32.totalorder %s384_s29, %s600_s4  ;;  %p606_p6 = scmp.lt.s32.totalorder %s600_s4, %s600_s4 }
  0x53   :  { %442 = vmatmul.mubr.msk.bf16.vlgmr.msra.gmra.mrb[0].mxu0 %vm106_vm1, %v82_v5  ;;  %p607_p7 = por %p606_p6, %p605_p5 }
  0x54   :  { %481 = vmatprep.mubr.msk.bf16.mxu0 %vm637_vm0, %v636_v0  ;;  %450 = vmatpush3.bf16.msra.mxu1 %v498_v7 }
  0x55   :  { %451 = vmatprep.subr.bf16.mxu1 %v636_v0  ;;  %466 = vmatpush3.bf16.msra.mxu0 %v504_v13  ;;  %p608_p8 = pnand %p607_p7, %p601_p4 }
  0x56   :  { %467 = vmatprep.subr.bf16.mxu0 %v636_v0 }
  0x58   :  { %452 = vmatpush3.bf16.msra.mxu1 %v499_v8 }
  0x59   :  { %453 = vmatprep.subr.bf16.mxu1 %v636_v0  ;;  %468 = vmatpush3.bf16.msra.mxu0 %v505_v14 }
  0x5a   :  { %469 = vmatprep.subr.bf16.mxu0 %v636_v0 }
  0x5c   :  { %454 = vmatpush3.bf16.msra.mxu1 %v500_v9 }
  0x5d   :  { %455 = vmatprep.subr.bf16.mxu1 %v636_v0  ;;  %470 = vmatpush3.bf16.msra.mxu0 %v506_v15 }
  0x5e   :  { %471 = vmatprep.subr.bf16.mxu0 %v636_v0 }
  0x60   :  { %456 = vmatpush3.bf16.msra.mxu1 %v501_v10 }
  0x61   :  { %457 = vmatprep.subr.bf16.mxu1 %v636_v0  ;;  %472 = vmatpush3.bf16.msra.mxu0 %v507_v16 }
  0x62   :  { %473 = vmatprep.subr.bf16.mxu0 %v636_v0 }
  0x64   :  { %458 = vmatpush3.bf16.msra.mxu1 %v502_v11 }
  0x65   :  { %459 = vmatprep.subr.bf16.mxu1 %v636_v0  ;;  %474 = vmatpush3.bf16.msra.mxu0 %v508_v17 }
  0x66   :  { %475 = vmatprep.subr.bf16.mxu0 %v636_v0 }
  0x68   :  { %460 = vmatpush3.bf16.msra.mxu1 %v503_v12 }
  0x69   :  { %476 = vmatpush3.bf16.msra.mxu0 %v509_v18 }
  0x6a   :  { %477 = vmatprep.subr.bf16.mxu0 %v636_v0 }
  0x6d   :  { %478 = vmatpush3.bf16.msra.mxu0 %v510_v27 }
  0x6e   :  { %479 = vmatprep.subr.bf16.mxu0 %v636_v0 }
  0x71   :  { %480 = vmatpush3.bf16.msra.mxu0 %v511_v28 }
 0x126   :  { %v144_v20 = vpop.f32.mrb[0].mxu0 }
 0x127   :  { %v145_v21 = vadd.f32 %v394_v19, %v144_v20  ;;  %v443_v22 = vpop.f32.mrb[1].mxu0 }
 0x128   :  { %v147_v23 = vpop.f32.mrb[2].mxu0 }
 0x129   :  { %v150_v24 = vmax.f32 %v145_v21, 0.0  ;;  %v444_v25 = vpop.f32.mrb[3].mxu0 }
 0x12b   :  { %v151_v26 = vpack.c.bf16 %v150_v24, %v150_v24 }
 0x12d   :  { %462 = vmatmul.mubr.bf16.vlgmr.msra.gmra.mrb[0].mxu1 %v151_v26 }
 0x200   :  { %v257_v30 = vpop.f32.mrb[0].mxu1 }
 0x201   :  { %v258_v31 = vadd.f32 %v398_v29, %v257_v30  ;;  %v463_v32 = vpop.f32.mrb[1].mxu1 }
 0x202   :  { %v260_v33 = vpop.f32.mrb[2].mxu1 }
 0x203   :  { %v263_v34 = vmax.f32 %v258_v31, 0.0  ;;  %v464_v35 = vpop.f32.mrb[3].mxu1 }
 0x205   :  { %v264_v36 = vpack.c.bf16 %v263_v34, %v263_v34 }
 0x207   :  { %482 = vmatmul.mubr.bf16.vlgmr.msra.gmra.mrb[4].mxu0 %v264_v36 }
 0x2da   :  { %v370_v38 = vpop.f32.mrb[4].mxu0 }
 0x2db   :  { %v371_v39 = vadd.f32 %v407_v37, %v370_v38  ;;  %v483_v40 = vpop.f32.mrb[5].mxu0 }
 0x2dc   :  { %v373_v41 = vpop.f32.mrb[6].mxu0 }
 0x2dd   :  { %376 = vst [vmem:[#allocation10] sm:$0xff] %v371_v39  ;;  %v484_v42 = vpop.f32.mrb[7].mxu0 }
 0x2de   :  { %611 = shalt.err (!%p608_p8)
}
 0x2df   :  { %s612_s6 = scalar_lea.hbm %s788_s7, 128 }
 0x2e0   :  { %p613_p9 = scmp.ne.s32.totalorder %s788_s7, %s612_s6  ;;  %p616_p10 = scmp.lt.u32.totalorder %s612_s6, %s788_s7 }
 0x2e2   :  { %p618_p11 = pnand %p616_p10, %p613_p9 }
 0x2e4   :  { %621 = shalt.err (!%p618_p11)
}
 0x2e5   :  { %386 = dma.vmem_to_hbm [thread:$0]  %s384_s29, 128, %s788_s7, [#allocation4]  }
 0x2e6   :  { %628 = dma.done.wait [#allocation4], 128  }
 0x2e7   :  { %629 = vsyncadd [#allocation4], 4294967168 }
 0x2e8   :  { %390 = vsyncpa [#allocation3], 1 }
 0x2e9   :  { %391 = vsyncpa [#allocation6], 1 }
 0x2ea   :  { %392 = vsyncpa [#allocation9], 1 }
 0x2eb   :  { %393 = vsyncpa [#allocation4], 1 }

</bundles_post_ra>
